<compile_context>
chip_gen: v7x
topology: tpu7x:2x2x1
jax: 0.10.0
libtpu: 0.0.40
codegen_flags: <defaults>
</compile_context>

<pallas_src>
import jax
import jax.numpy as jnp
from jax.experimental import pallas as pl
from jax.experimental.pallas import tpu as pltpu


def _round_up(x, m):
    return ((x + m - 1) // m) * m


def _netg_synth_kernel(x_ref, w1_ref, b1_ref, w2_ref, b2_ref, o_ref):
    # ---- Layer 1: (TB, nz) @ (nz, Hp) + b1, with nz tiny (2). ----
    # A K=2 matmul would push an almost fully padded weight tile through the
    # MXU for ~32 real MACs; do it as nz broadcast multiply-adds on the VPU.
    x = x_ref[...].astype(jnp.float32)               # in-kernel cast: free VPU filler
    nz = x_ref.shape[1]
    h = b1_ref[...]                                  # (1, Hp) -> broadcasts over batch
    for k in range(nz):                              # static, tiny unroll
        h = h + x[:, k:k + 1] * w1_ref[k:k + 1, :]   # (TB,1)*(1,Hp) VPU FMA
    # LeakyReLU(negative_slope=0.2): 2 VPU ops, f32 (v5e has no bf16 VPU).
    h = jnp.maximum(h, 0.2 * h)
    # ---- Layer 2: the only real matmul, bf16 operands, f32 MXU accumulation. ----
    out = jnp.dot(h.astype(jnp.bfloat16), w2_ref[...],
                  preferred_element_type=jnp.float32)  # (TB, Np) f32
    o_ref[...] = (out + b2_ref[...]).astype(o_ref.dtype)


def prepare_params(w1, b1, w2, b2):
    """Pad params to lane-dense shapes and cast w2 to bf16 (done once, reused)."""
    nz, H = w1.shape
    dimx = w2.shape[1]
    Hp = _round_up(H, 128)      # 1000 -> 1024 (also multiple of 16 for bf16 sublanes)
    Np = _round_up(dimx, 128)   # 100  -> 128  (unmasked vst on the output)

    w1p = jnp.zeros((nz, Hp), jnp.float32).at[:, :H].set(w1.astype(jnp.float32))
    b1p = jnp.zeros((1, Hp), jnp.float32).at[:, :H].set(b1.astype(jnp.float32))
    # Padded rows/cols of w2 and b2 are zero, so padded hidden lanes contribute
    # nothing and padded output lanes are sliced off (or ignored) by the caller.
    w2p = jnp.zeros((Hp, Np), jnp.bfloat16).at[:H, :dimx].set(w2.astype(jnp.bfloat16))
    b2p = jnp.zeros((1, Np), jnp.float32).at[:, :dimx].set(b2.astype(jnp.float32))
    return w1p, b1p, w2p, b2p, dimx


def netg_synth_forward(x, w1p, b1p, w2p, b2p, dimx, *,
                       block_b=512, slice_output=True):
    """Forward pass.

    x: (B, nz) any float dtype; padded params from prepare_params.
    block_b: batch tile (rows per grid step). 512 keeps the per-tile f32 hidden
      activation at 2 MiB (safe on v7x's 64 MiB VMEM); v5e/v6e can go larger.
    slice_output: if False, return the padded (Bp, Np) result (no extra XLA
      slice launch); logical shape is (B, dimx).
    """
    B, nz = x.shape
    Hp, Np = w2p.shape

    # Batch multiple of 16 keeps the bf16 matmul LHS sublane-dense; also makes
    # B divisible by the batch tile.  (Best case: caller already supplies B as
    # a multiple of 16 -> no pad op here.)
    Bp = _round_up(B, 16)
    tb = min(block_b, Bp)
    Bp = _round_up(Bp, tb)
    x_in = x if Bp == B else jnp.pad(x, ((0, Bp - B), (0, 0)))

    out = pl.pallas_call(
        _netg_synth_kernel,
        out_shape=jax.ShapeDtypeStruct((Bp, Np), jnp.float32),
        grid=(Bp // tb,),
        in_specs=[
            pl.BlockSpec((tb, nz), lambda i: (i, 0)),    # batch-tiled activations
            pl.BlockSpec((nz, Hp), lambda i: (0, 0)),    # weights: constant index_map
            pl.BlockSpec((1, Hp), lambda i: (0, 0)),     #  -> VMEM-resident across grid
            pl.BlockSpec((Hp, Np), lambda i: (0, 0)),
            pl.BlockSpec((1, Np), lambda i: (0, 0)),
        ],
        out_specs=pl.BlockSpec((tb, Np), lambda i: (i, 0)),
        compiler_params=pltpu.CompilerParams(
            dimension_semantics=("parallel",)),          # megacore split on v7x
    )(x_in, w1p, b1p, w2p, b2p)

    if not slice_output:
        return out                       # (Bp, Np) padded; logical (B, dimx)
    return out[:B, :dimx]


def init_params(key, nz=2, hidden=1000, dimx=100):
    """Deterministic synthetic parameter init (PyTorch-Linear-like uniform)."""
    k1, k2, k3, k4 = jax.random.split(key, 4)
    bound1 = 1.0 / jnp.sqrt(nz)
    bound2 = 1.0 / jnp.sqrt(hidden)
    w1 = jax.random.uniform(k1, (nz, hidden), jnp.float32, -bound1, bound1)
    b1 = jax.random.uniform(k2, (hidden,), jnp.float32, -bound1, bound1)
    w2 = jax.random.uniform(k3, (hidden, dimx), jnp.float32, -bound2, bound2)
    b2 = jax.random.uniform(k4, (dimx,), jnp.float32, -bound2, bound2)
    return w1, b1, w2, b2


def reference_forward(x, w1, b1, w2, b2):
    h = x @ w1 + b1
    h = jnp.where(h > 0, h, 0.2 * h)
    return h @ w2 + b2


if __name__ == "__main__":
    key = jax.random.PRNGKey(0)
    kx, kp = jax.random.split(key)

    B, NZ, HIDDEN, DIMX = 8, 2, 1000, 100
    x = jax.random.normal(kx, (B, NZ), jnp.float32)
    w1, b1, w2, b2 = init_params(kp, nz=NZ, hidden=HIDDEN, dimx=DIMX)

    # One-time layout prep (padding + bf16 cast of w2).
    w1p, b1p, w2p, b2p, dimx = prepare_params(w1, b1, w2, b2)

    out = netg_synth_forward(x, w1p, b1p, w2p, b2p, dimx)
    out = jax.block_until_ready(out)

    ref = reference_forward(x, w1, b1, w2, b2)
    assert out.shape == (B, DIMX)
    # Second matmul runs in bf16 (f32 accumulation), so allow bf16-level
    # tolerance vs. the pure-f32 reference.
    assert jnp.allclose(out, ref, atol=2e-2, rtol=2e-2), float(
        jnp.max(jnp.abs(out - ref)))

    # Also exercise a larger, multi-tile batch (grid > 1, tiles split across
    # TensorCores on v7x) to validate the gridded path.
    B2 = 1024
    x2 = jax.random.normal(jax.random.PRNGKey(1), (B2, NZ), jnp.float32)
    out2 = jax.block_until_ready(
        netg_synth_forward(x2, w1p, b1p, w2p, b2p, dimx, block_b=512))
    ref2 = reference_forward(x2, w1, b1, w2, b2)
    assert out2.shape == (B2, DIMX)
    assert jnp.allclose(out2, ref2, atol=2e-2, rtol=2e-2), float(
        jnp.max(jnp.abs(out2 - ref2)))

    print("KERNEL_OK")
</pallas_src>

<mosaic_0001>
module attributes {stable_mosaic.version = 11 : i64} {
  func.func @_netg_synth_kernel(%arg0: i32, %arg1: memref<16x2xf32, #tpu.memory_space<vmem>>, %arg2: memref<2x1024xf32, #tpu.memory_space<vmem>>, %arg3: memref<1x1024xf32, #tpu.memory_space<vmem>>, %arg4: memref<1024x128xbf16, #tpu.memory_space<vmem>>, %arg5: memref<1x128xf32, #tpu.memory_space<vmem>>, %arg6: memref<16x128xf32, #tpu.memory_space<vmem>>) attributes {dimension_semantics = [#tpu.dimension_semantics<parallel>], iteration_bounds = array<i64: 1>, scalar_prefetch = 0 : i64, scratch_operands = 0 : i64, tpu.core_type = #tpu.core_type<tc>, window_params = [{transform_indices = @transform_0, window_bounds = array<i64: 16, 2>}, {pipeline_mode = #tpu.pipeline_mode<synchronous>, transform_indices = @transform_1, window_bounds = array<i64: 2, 1024>}, {pipeline_mode = #tpu.pipeline_mode<synchronous>, transform_indices = @transform_2, window_bounds = array<i64: 1, 1024>}, {pipeline_mode = #tpu.pipeline_mode<synchronous>, transform_indices = @transform_3, window_bounds = array<i64: 1024, 128>}, {pipeline_mode = #tpu.pipeline_mode<synchronous>, transform_indices = @transform_4, window_bounds = array<i64: 1, 128>}, {transform_indices = @transform_5, window_bounds = array<i64: 16, 128>}]} {
    %c0 = arith.constant 0 : index
    %c0_0 = arith.constant 0 : index
    %0 = vector.load %arg1[%c0, %c0_0] : memref<16x2xf32, #tpu.memory_space<vmem>>, vector<16x2xf32>
    %c0_1 = arith.constant 0 : index
    %c0_2 = arith.constant 0 : index
    %1 = vector.load %arg3[%c0_1, %c0_2] : memref<1x1024xf32, #tpu.memory_space<vmem>>, vector<1x1024xf32>
    %2 = vector.extract_strided_slice %0 {offsets = [0, 0], sizes = [16, 1], strides = [1, 1]} : vector<16x2xf32> to vector<16x1xf32>
    %c0_3 = arith.constant 0 : index
    %c0_4 = arith.constant 0 : index
    %3 = vector.load %arg2[%c0_3, %c0_4] : memref<2x1024xf32, #tpu.memory_space<vmem>>, vector<1x1024xf32>
    %4 = vector.broadcast %2 : vector<16x1xf32> to vector<16x1024xf32>
    %5 = vector.broadcast %3 : vector<1x1024xf32> to vector<16x1024xf32>
    %6 = arith.mulf %4, %5 : vector<16x1024xf32>
    %7 = vector.broadcast %1 : vector<1x1024xf32> to vector<16x1024xf32>
    %8 = arith.addf %7, %6 : vector<16x1024xf32>
    %9 = vector.extract_strided_slice %0 {offsets = [0, 1], sizes = [16, 1], strides = [1, 1]} : vector<16x2xf32> to vector<16x1xf32>
    %c1 = arith.constant 1 : index
    %c0_5 = arith.constant 0 : index
    %10 = vector.load %arg2[%c1, %c0_5] : memref<2x1024xf32, #tpu.memory_space<vmem>>, vector<1x1024xf32>
    %11 = vector.broadcast %9 : vector<16x1xf32> to vector<16x1024xf32>
    %12 = vector.broadcast %10 : vector<1x1024xf32> to vector<16x1024xf32>
    %13 = arith.mulf %11, %12 : vector<16x1024xf32>
    %14 = arith.addf %8, %13 : vector<16x1024xf32>
    %cst = arith.constant 2.000000e-01 : f32
    %15 = vector.broadcast %cst : f32 to vector<16x1024xf32>
    %16 = arith.mulf %15, %14 : vector<16x1024xf32>
    %17 = arith.maximumf %14, %16 : vector<16x1024xf32>
    %18 = arith.truncf %17 : vector<16x1024xf32> to vector<16x1024xbf16>
    %c0_6 = arith.constant 0 : index
    %c0_7 = arith.constant 0 : index
    %19 = vector.load %arg4[%c0_6, %c0_7] : memref<1024x128xbf16, #tpu.memory_space<vmem>>, vector<1024x128xbf16>
    %cst_8 = arith.constant dense<0.000000e+00> : vector<16x128xf32>
    %20 = tpu.matmul %18, %19, %cst_8 {dimension_numbers = #tpu.dot_dimension_numbers<[1], [0], [0], [1], [0, 0, 1, 1], [], []>} : vector<16x1024xbf16>, vector<1024x128xbf16>, vector<16x128xf32> -> vector<16x128xf32>
    %c0_9 = arith.constant 0 : index
    %c0_10 = arith.constant 0 : index
    %21 = vector.load %arg5[%c0_9, %c0_10] : memref<1x128xf32, #tpu.memory_space<vmem>>, vector<1x128xf32>
    %22 = vector.broadcast %21 : vector<1x128xf32> to vector<16x128xf32>
    %23 = arith.addf %20, %22 : vector<16x128xf32>
    %c0_11 = arith.constant 0 : index
    %c0_12 = arith.constant 0 : index
    %24 = vector.load %arg6[%c0_11, %c0_12] : memref<16x128xf32, #tpu.memory_space<vmem>>, vector<16x128xf32>
    tpu.vector_store %arg6[%c0_11, %c0_12], %23 {strides = array<i32>} : memref<16x128xf32, #tpu.memory_space<vmem>>, vector<16x128xf32>,
    return
  }
  func.func @transform_0(%arg0: i32) -> (i32, i32) {
    %c0_i32 = arith.constant 0 : i32
    %c0_i32_0 = arith.constant 0 : i32
    return %arg0, %c0_i32 : i32, i32
  }
  func.func @transform_1(%arg0: i32) -> (i32, i32) {
    %c0_i32 = arith.constant 0 : i32
    %c0_i32_0 = arith.constant 0 : i32
    %c0_i32_1 = arith.constant 0 : i32
    return %c0_i32, %c0_i32_0 : i32, i32
  }
  func.func @transform_2(%arg0: i32) -> (i32, i32) {
    %c0_i32 = arith.constant 0 : i32
    %c0_i32_0 = arith.constant 0 : i32
    %c0_i32_1 = arith.constant 0 : i32
    return %c0_i32, %c0_i32_0 : i32, i32
  }
  func.func @transform_3(%arg0: i32) -> (i32, i32) {
    %c0_i32 = arith.constant 0 : i32
    %c0_i32_0 = arith.constant 0 : i32
    %c0_i32_1 = arith.constant 0 : i32
    return %c0_i32, %c0_i32_0 : i32, i32
  }
  func.func @transform_4(%arg0: i32) -> (i32, i32) {
    %c0_i32 = arith.constant 0 : i32
    %c0_i32_0 = arith.constant 0 : i32
    %c0_i32_1 = arith.constant 0 : i32
    return %c0_i32, %c0_i32_0 : i32, i32
  }
  func.func @transform_5(%arg0: i32) -> (i32, i32) {
    %c0_i32 = arith.constant 0 : i32
    %c0_i32_0 = arith.constant 0 : i32
    return %arg0, %c0_i32 : i32, i32
  }
}

</mosaic_0001>

<bundles_post_ra>
// kernel: tpu_custom_call.1
= control target key start
LH: loop header
LB: loop body
LE: loop exit
PB: predicated region body
PF: predicated region fallthrough
CT: control target
= control target key end

     0   :  { %10 = vsyncpa [#allocation3], 0  ;;  %s1438_s0 = inlined_call_operand.vmem [shape: f32[16,2], index: 0, kind: input, shape index: {}]   ;;  %s1439_s1 = inlined_call_operand.vmem [shape: f32[2,1024], index: 1, kind: input, shape index: {}]   ;;  %s1440_s2 = inlined_call_operand.vmem [shape: f32[1,1024], index: 2, kind: input, shape index: {}]   ;;  %s1441_s3 = inlined_call_operand.hbm [shape: bf16[1024,128], index: 3, kind: input, shape index: {}]   ;;  %s1442_s4 = inlined_call_operand.vmem [shape: f32[1,128], index: 4, kind: input, shape index: {}]   ;;  %s1443_s5 = inlined_call_operand.hbm [shape: f32[16,128], index: 5, kind: output, shape index: {}]  }
   0x1   :  { %11 = vsyncpa [#allocation4], 0  ;;  %s1266_s18 = smov [#allocation2]   ;;  %s1218_s22 = scalar_lea.hbm %s1441_s3, 8192 }
   0x2   :  { %s23_s19 = sshll.u32 %s1266_s18, 4  ;;  %p1219_p0 = scmp.ne.s32.totalorder %s1441_s3, %s1218_s22  ;;  %s24_s19 = int_to_ptr.vmem [resolvable:$true] %s23_s19 }
   0x3   :  { %p1222_p1 = scmp.lt.u32.totalorder %s1218_s22, %s1441_s3 }
   0x5   :  { %p1224_p2 = pnand %p1222_p1, %p1219_p0 }
   0x7   :  { %1227 = shalt.err (!%p1224_p2)
}
   0x8   :  { %s1228_s27 = scalar_lea.vmem %s24_s19, 8192  ;;  %p1233_p4 = scmp.lt.s32.totalorder %s24_s19, %s24_s19 }
   0x9   :  { %p1229_p3 = scmp.ne.s32.totalorder %s24_s19, %s1228_s27  ;;  %p1234_p5 = scmp.lt.s32.totalorder %s1228_s27, %s1228_s27 }
   0xb   :  { %p1235_p6 = por %p1234_p5, %p1233_p4 }
   0xd   :  { %p1236_p7 = pnand %p1235_p6, %p1229_p3 }
   0xf   :  { %1239 = shalt.err (!%p1236_p7)
}
  0x10   :  { %s1267_s28 = smov 64   ;;  %s1268_s29 = smov 4  }
  0x11   :  { %29 = dma.hbm_to_vmem [thread:$0]  %s1441_s3, 8192, %s24_s19, [#allocation3], %s1267_s28, %s1267_s28, %s1268_s29  }
  0x12   :  { %1262 = dma.done.wait [#allocation3], 8192  }
  0x13   :  { %1263 = vsyncadd [#allocation3], 4294959104  ;;  %v1269_v0 = vmov 1   ;;  %v1270_v1 = vmov 0   ;;  %v36_v2 = vld [vmem:[%s1438_s0] sm:$0xff]  ;;  %v37_v3 = vld [vmem:[%s1438_s0 + $0x8] sm:$0xff]  ;;  %v51_v38 = vlaneseq }
  0x14   :  { %1152 = vset.pattern.permute.xlu1 %v1269_v0  ;;  %1151 = vset.pattern.permute.xlu0 %v1270_v1  ;;  %v1154_v4 = vld [vmem:[#allocation2 + $0x40] sm:$0xff]   ;;  %v1158_v8 = vld [vmem:[#allocation2 + $0x48] sm:$0xff]   ;;  %v1162_v12 = vld [vmem:[#allocation2 + $0x50] sm:$0xff]  }
  0x15   :  { %167 = vperm.xlu1 %1152, %v36_v2   ;;  %42 = vperm.xlu0 %1151, %v36_v2   ;;  %v1155_v5 = vld [vmem:[#allocation2 + $0xc0] sm:$0xff]   ;;  %v1159_v9 = vld [vmem:[#allocation2 + $0xc8] sm:$0xff]   ;;  %v1163_v13 = vld [vmem:[#allocation2 + $0xd0] sm:$0xff]   ;;  %v1322_v39 = vshrl.u32 %v51_v38, 7 }
  0x16   :  { %1055 = vmatprep.subr.bf16.mxu0 %v1154_v4  ;;  %v1156_v6 = vld [vmem:[#allocation2] sm:$0xff]   ;;  %1077 = vmatprep.subr.bf16.mxu1 %v1155_v5  ;;  %v1160_v10 = vld [vmem:[#allocation2 + $0x8] sm:$0xff]   ;;  %v1164_v14 = vld [vmem:[#allocation2 + $0x10] sm:$0xff]  }
  0x17   :  { %v1157_v7 = vld [vmem:[#allocation2 + $0x80] sm:$0xff]   ;;  %1056 = vmatpush3.bf16.msra.mxu0 %v1156_v6  ;;  %v1161_v11 = vld [vmem:[#allocation2 + $0x88] sm:$0xff]   ;;  %v1165_v15 = vld [vmem:[#allocation2 + $0x90] sm:$0xff]   ;;  %v57_v41 = vsub.s32 1, %v1322_v39  ;;  %v65_v42 = vsub.s32 3, %v1322_v39  ;;  %v53_v45 = vsub.s32 0, %v1322_v39 }
  0x18   :  { %1078 = vmatpush3.bf16.msra.mxu1 %v1157_v7  ;;  %1057 = vmatprep.subr.bf16.mxu0 %v1158_v8  ;;  %v1166_v16 = vld [vmem:[#allocation2 + $0x58] sm:$0xff]   ;;  %v1170_v20 = vld [vmem:[#allocation2 + $0x60] sm:$0xff]   ;;  %v1174_v24 = vld [vmem:[#allocation2 + $0x68] sm:$0xff]   ;;  %v61_v46 = vsub.s32 2, %v1322_v39  ;;  %v73_v47 = vsub.s32 5, %v1322_v39  ;;  %v81_v50 = vsub.s32 7, %v1322_v39 }
  0x19   :  { %171 = vperm.xlu1 %1152, %v37_v3   ;;  %47 = vperm.xlu0 %1151, %v37_v3   ;;  %v1167_v17 = vld [vmem:[#allocation2 + $0xd8] sm:$0xff]   ;;  %v1171_v21 = vld [vmem:[#allocation2 + $0xe0] sm:$0xff]   ;;  %v1175_v25 = vld [vmem:[#allocation2 + $0xe8] sm:$0xff]  }
  0x1a   :  { %1079 = vmatprep.subr.bf16.mxu1 %v1159_v9  ;;  %v1168_v18 = vld [vmem:[#allocation2 + $0x18] sm:$0xff]   ;;  %v1172_v22 = vld [vmem:[#allocation2 + $0x20] sm:$0xff]   ;;  %v1176_v26 = vld [vmem:[#allocation2 + $0x28] sm:$0xff]  }
  0x1b   :  { %1058 = vmatpush3.bf16.msra.mxu0 %v1160_v10  ;;  %v1169_v19 = vld [vmem:[#allocation2 + $0x98] sm:$0xff]   ;;  %v1173_v23 = vld [vmem:[#allocation2 + $0xa0] sm:$0xff]   ;;  %v1177_v27 = vld [vmem:[#allocation2 + $0xa8] sm:$0xff]  }
  0x1c   :  { %1080 = vmatpush3.bf16.msra.mxu1 %v1161_v11  ;;  %1059 = vmatprep.subr.bf16.mxu0 %v1162_v12  ;;  %v1178_v28 = vld [vmem:[#allocation2 + $0x70] sm:$0xff]   ;;  %v1182_v32 = vld [vmem:[#allocation2 + $0x78] sm:$0xff]   ;;  %v1186_v36 = vld [vmem:[#allocation2 + $0x140] sm:$0xff]  }
  0x1d   :  { %1153 = vset.pattern.permute.xlu0 %v1269_v0  ;;  %1081 = vmatprep.subr.bf16.mxu1 %v1163_v13  ;;  %v1179_v29 = vld [vmem:[#allocation2 + $0xf0] sm:$0xff]   ;;  %v1183_v33 = vld [vmem:[#allocation2 + $0xf8] sm:$0xff]   ;;  %v1187_v37 = vld [vmem:[#allocation2 + $0x1c0] sm:$0xff]  }
  0x1e   :  { %v1180_v30 = vld [vmem:[#allocation2 + $0x30] sm:$0xff]   ;;  %v1184_v34 = vld [vmem:[#allocation2 + $0x38] sm:$0xff]   ;;  %v1327_v40 = vld [vmem:[%s1440_s2] sm:$0xff] }
  0x1f   :  { %1060 = vmatpush3.bf16.msra.mxu0 %v1164_v14  ;;  %v1181_v31 = vld [vmem:[#allocation2 + $0xb0] sm:$0xff]   ;;  %v1185_v35 = vld [vmem:[#allocation2 + $0xb8] sm:$0xff]   ;;  %v115_v48 = vrot.slane %v1327_v40, %v57_v41  ;;  %v123_v49 = vrot.slane %v1327_v40, %v65_v42  ;;  %v111_v59 = vrot.slane %v1327_v40, %v53_v45  ;;  %v119_v60 = vrot.slane %v1327_v40, %v61_v46 }
  0x20   :  { %1082 = vmatpush3.bf16.msra.mxu1 %v1165_v15  ;;  %1061 = vmatprep.subr.bf16.mxu0 %v1166_v16  ;;  %v1334_v43 = vld [vmem:[%s1439_s1] ss:$2 sm:$0xff]  ;;  %v1339_v44 = vld [vmem:[%s1439_s1 + $0x1] ss:$2 sm:$0xff]  ;;  %v131_v1 = vrot.slane %v1327_v40, %v73_v47  ;;  %v1368_v3 = vrot.slane %v1327_v40, %v81_v50 }
  0x21   :  { %1083 = vmatprep.subr.bf16.mxu1 %v1167_v17  ;;  %v58_v51 = vrot.slane %v1334_v43, %v57_v41  ;;  %v182_v52 = vrot.slane %v1339_v44, %v57_v41  ;;  %v66_v53 = vrot.slane %v1334_v43, %v65_v42  ;;  %v190_v54 = vrot.slane %v1339_v44, %v65_v42 }
  0x22   :  { %v54_v55 = vrot.slane %v1334_v43, %v53_v45  ;;  %v178_v56 = vrot.slane %v1339_v44, %v53_v45  ;;  %v62_v57 = vrot.slane %v1334_v43, %v61_v46  ;;  %v186_v58 = vrot.slane %v1339_v44, %v61_v46 }
  0x23   :  { %1062 = vmatpush3.bf16.msra.mxu0 %v1168_v18  ;;  %v74_v61 = vrot.slane %v1334_v43, %v73_v47  ;;  %v198_v62 = vrot.slane %v1339_v44, %v73_v47  ;;  %v1365_v2 = vrot.slane %v1334_v43, %v81_v50  ;;  %v1371_v4 = vrot.slane %v1339_v44, %v81_v50 }
  0x24   :  { %1084 = vmatpush3.bf16.msra.mxu1 %v1169_v19  ;;  %1063 = vmatprep.subr.bf16.mxu0 %v1170_v20 }
  0x25   :  { %1085 = vmatprep.subr.bf16.mxu1 %v1171_v21 }
  0x27   :  { %1064 = vmatpush3.bf16.msra.mxu0 %v1172_v22 }
  0x28   :  { %1086 = vmatpush3.bf16.msra.mxu1 %v1173_v23  ;;  %1065 = vmatprep.subr.bf16.mxu0 %v1174_v24 }
  0x29   :  { %1087 = vmatprep.subr.bf16.mxu1 %v1175_v25 }
  0x2b   :  { %1066 = vmatpush3.bf16.msra.mxu0 %v1176_v26 }
  0x2c   :  { %1088 = vmatpush3.bf16.msra.mxu1 %v1177_v27  ;;  %1067 = vmatprep.subr.bf16.mxu0 %v1178_v28 }
  0x2d   :  { %1089 = vmatprep.subr.bf16.mxu1 %v1179_v29 }
  0x2f   :  { %1068 = vmatpush3.bf16.msra.mxu0 %v1180_v30 }
  0x30   :  { %1090 = vmatpush3.bf16.msra.mxu1 %v1181_v31  ;;  %1069 = vmatprep.subr.bf16.mxu0 %v1182_v32 }
  0x31   :  { %1091 = vmatprep.subr.bf16.mxu1 %v1183_v33 }
  0x33   :  { %1070 = vmatpush3.bf16.msra.mxu0 %v1184_v34 }
  0x34   :  { %1092 = vmatpush3.bf16.msra.mxu1 %v1185_v35  ;;  %1099 = vmatprep.subr.bf16.mxu0 %v1186_v36 }
  0x35   :  { %1121 = vmatprep.subr.bf16.mxu1 %v1187_v37 }
  0x94   :  { %v1359_v63 = vpop.permute.xlu1 %167  ;;  %v1361_v0 = vpop.permute.xlu0 %42 }
  0x95   :  { %v92_v5 = vmul.f32 %v58_v51, %v1361_v0  ;;  %v216_v6 = vmul.f32 %v182_v52, %v1359_v63  ;;  %v94_v7 = vmul.f32 %v66_v53, %v1361_v0  ;;  %v218_v8 = vmul.f32 %v190_v54, %v1359_v63 }
  0x96   :  { %v91_v9 = vmul.f32 %v54_v55, %v1361_v0  ;;  %v215_v10 = vmul.f32 %v178_v56, %v1359_v63  ;;  %v93_v11 = vmul.f32 %v62_v57, %v1361_v0  ;;  %v217_v12 = vmul.f32 %v186_v58, %v1359_v63 }
  0x97   :  { %v149_v13 = vadd.f32 %v115_v48, %v92_v5  ;;  %v151_v14 = vadd.f32 %v123_v49, %v94_v7  ;;  %v96_v15 = vmul.f32 %v74_v61, %v1361_v0  ;;  %v220_v16 = vmul.f32 %v198_v62, %v1359_v63 }
  0x98   :  { %v1383_v17 = vpop.permute.xlu1 %171  ;;  %v1385_v18 = vpop.permute.xlu0 %47  ;;  %v148_v19 = vadd.f32 %v111_v59, %v91_v9  ;;  %v150_v20 = vadd.f32 %v119_v60, %v93_v11  ;;  %v98_v21 = vmul.f32 %v1365_v2, %v1361_v0  ;;  %v222_v22 = vmul.f32 %v1371_v4, %v1359_v63 }
  0x99   :  { %v100_v23 = vmul.f32 %v58_v51, %v1385_v18  ;;  %v224_v24 = vmul.f32 %v182_v52, %v1383_v17  ;;  %v232_v25 = vadd.f32 %v216_v6, %v149_v13  ;;  %v102_v26 = vmul.f32 %v66_v53, %v1385_v18  ;;  %v1188_v13 = vld [vmem:[#allocation2 + $0x100] sm:$0xff]  }
  0x9a   :  { %v226_v27 = vmul.f32 %v190_v54, %v1383_v17  ;;  %v234_v28 = vadd.f32 %v218_v8, %v151_v14  ;;  %v99_v29 = vmul.f32 %v54_v55, %v1385_v18  ;;  %v223_v30 = vmul.f32 %v178_v56, %v1383_v17 }
  0x9b   :  { %v157_v31 = vadd.f32 %v115_v48, %v100_v23  ;;  %v248_v32 = vmul.f32 0.2, %v232_v25  ;;  %v159_v33 = vadd.f32 %v123_v49, %v102_v26  ;;  %v231_v34 = vadd.f32 %v215_v10, %v148_v19 }
  0x9c   :  { %v250_v35 = vmul.f32 0.2, %v234_v28  ;;  %v156_v36 = vadd.f32 %v111_v59, %v99_v29  ;;  %v101_v37 = vmul.f32 %v62_v57, %v1385_v18  ;;  %v225_v38 = vmul.f32 %v186_v58, %v1383_v17 }
  0x9d   :  { %v240_v41 = vadd.f32 %v224_v24, %v157_v31  ;;  %v264_v42 = vmax.f32 %v232_v25, %v248_v32  ;;  %v242_v45 = vadd.f32 %v226_v27, %v159_v33  ;;  %v247_v46 = vmul.f32 0.2, %v231_v34  ;;  %v1190_v24 = vld [vmem:[#allocation2 + $0x148] sm:$0xff]   ;;  %v1194_v32 = vld [vmem:[#allocation2 + $0x150] sm:$0xff]  }
  0x9e   :  { %v266_v47 = vmax.f32 %v234_v28, %v250_v35  ;;  %v239_v50 = vadd.f32 %v223_v30, %v156_v36  ;;  %v158_v51 = vadd.f32 %v119_v60, %v101_v37  ;;  %v233_v52 = vadd.f32 %v217_v12, %v150_v20  ;;  %v1191_v28 = vld [vmem:[#allocation2 + $0x1c8] sm:$0xff]   ;;  %v1195_v35 = vld [vmem:[#allocation2 + $0x1d0] sm:$0xff]  }
  0x9f   :  { %v256_v53 = vmul.f32 0.2, %v240_v41  ;;  %v258_v54 = vmul.f32 0.2, %v242_v45  ;;  %v263_v48 = vmax.f32 %v231_v34, %v247_v46  ;;  %v104_v49 = vmul.f32 %v74_v61, %v1385_v18  ;;  %v1192_v31 = vld [vmem:[#allocation2 + $0x108] sm:$0xff]   ;;  %v1196_v37 = vld [vmem:[#allocation2 + $0x110] sm:$0xff]  }
  0xa0   :  { %v255_v55 = vmul.f32 0.2, %v239_v50  ;;  %v241_v56 = vadd.f32 %v225_v38, %v158_v51  ;;  %v249_v59 = vmul.f32 0.2, %v233_v52  ;;  %v153_v5 = vadd.f32 %v131_v1, %v96_v15  ;;  %v1198_v38 = vld [vmem:[#allocation2 + $0x158] sm:$0xff]   ;;  %v1202_v51 = vld [vmem:[#allocation2 + $0x160] sm:$0xff]  }
  0xa1   :  { %v272_v57 = vmax.f32 %v240_v41, %v256_v53  ;;  %v274_v6 = vmax.f32 %v242_v45, %v258_v54  ;;  %v161_v58 = vadd.f32 %v131_v1, %v104_v49  ;;  %v228_v7 = vmul.f32 %v198_v62, %v1383_v17  ;;  %v1189_v62 = vld [vmem:[#allocation2 + $0x180] sm:$0xff]   ;;  %v1197_v45 = vld [vmem:[#allocation2 + $0x190] sm:$0xff]   ;;  %v1199_v46 = vld [vmem:[#allocation2 + $0x1d8] sm:$0xff]  }
  0xa2   :  { %v271_v8 = vmax.f32 %v239_v50, %v255_v55  ;;  %v257_v9 = vmul.f32 0.2, %v241_v56  ;;  %v265_v10 = vmax.f32 %v233_v52, %v249_v59  ;;  %v236_v11 = vadd.f32 %v220_v16, %v153_v5  ;;  %v1200_v50 = vld [vmem:[#allocation2 + $0x118] sm:$0xff]   ;;  %v1204_v59 = vld [vmem:[#allocation2 + $0x120] sm:$0xff]   ;;  %v1206_v5 = vld [vmem:[#allocation2 + $0x168] sm:$0xff]  }
  0xa3   :  { %v280_v60 = vpack.c.bf16 %v272_v57, %v264_v42  ;;  %v282_v12 = vpack.c.bf16 %v274_v6, %v266_v47  ;;  %v244_v14 = vadd.f32 %v228_v7, %v161_v58  ;;  %v106_v61 = vmul.f32 %v1365_v2, %v1385_v18  ;;  %v1201_v54 = vld [vmem:[#allocation2 + $0x198] sm:$0xff]   ;;  %v1205_v7 = vld [vmem:[#allocation2 + $0x1a0] sm:$0xff]  }
  0xa4   :  { %v279_v19 = vpack.c.bf16 %v271_v8, %v263_v48  ;;  %v273_v20 = vmax.f32 %v241_v56, %v257_v9  ;;  %v252_v23 = vmul.f32 0.2, %v236_v11  ;;  %v155_v15 = vadd.f32 %v1368_v3, %v98_v21  ;;  %v1207_v8 = vld [vmem:[#allocation2 + $0x1e8] sm:$0xff]  }
  0xa5   :  { %838 = vmatprep.mubr.bf16.mxu0 %v280_v60  ;;  %879 = vmatprep.mubr.bf16.mxu1 %v282_v12  ;;  %v260_v1 = vmul.f32 0.2, %v244_v14  ;;  %v163_v25 = vadd.f32 %v1368_v3, %v106_v61  ;;  %v230_v16 = vmul.f32 %v1371_v4, %v1383_v17  ;;  %v1193_v3 = vld [vmem:[#allocation2 + $0x188] sm:$0xff]   ;;  %v69_v4 = vsub.s32 4, %v1322_v39  ;;  %v1210_v12 = vld [vmem:[#allocation2 + $0x170] sm:$0xff]  }
  0xa6   :  { %839 = vmatmul.mubr.bf16.vlgmr.msra.gmra.mrb[0].mxu0 %v279_v19  ;;  %v281_v26 = vpack.c.bf16 %v273_v20, %v265_v10  ;;  %v238_v27 = vadd.f32 %v222_v22, %v155_v15  ;;  %v268_v2 = vmax.f32 %v236_v11, %v252_v23  ;;  %v77_v41 = vsub.s32 6, %v1322_v39  ;;  %v1203_v39 = vld [vmem:[#allocation2 + $0x1e0] sm:$0xff]   ;;  %v1208_v60 = vld [vmem:[#allocation2 + $0x128] sm:$0xff]   ;;  %v1211_v61 = vld [vmem:[#allocation2 + $0x1f0] sm:$0xff]  }
  0xa7   :  { %1100 = vmatpush3.bf16.msra.mxu0 %v1188_v13  ;;  %v276_v29 = vmax.f32 %v244_v14, %v260_v1  ;;  %v246_v30 = vadd.f32 %v230_v16, %v163_v25  ;;  %v70_v47 = vrot.slane %v1334_v43, %v69_v4  ;;  %v127_v49 = vrot.slane %v1327_v40, %v69_v4  ;;  %v1209_v14 = vld [vmem:[#allocation2 + $0x1a8] sm:$0xff]   ;;  %v1212_v23 = vld [vmem:[#allocation2 + $0x130] sm:$0xff]   ;;  %v1214_v15 = vld [vmem:[#allocation2 + $0x178] sm:$0xff]  }
  0xa8   :  { %880 = vmatmul.mubr.bf16.vlgmr.msra.gmra.mrb[0].mxu1 %v281_v26  ;;  %v254_v21 = vmul.f32 0.2, %v238_v27  ;;  %1101 = vmatprep.subr.bf16.mxu0 %v1190_v24  ;;  %v78_v53 = vrot.slane %v1334_v43, %v77_v41  ;;  %v194_v55 = vrot.slane %v1339_v44, %v69_v4  ;;  %v135_v43 = vrot.slane %v1327_v40, %v77_v41  ;;  %v1213_v1 = vld [vmem:[#allocation2 + $0x1b0] sm:$0xff]   ;;  %v1215_v25 = vld [vmem:[#allocation2 + $0x1f8] sm:$0xff]  }
  0xa9   :  { %1122 = vmatpush3.bf16.msra.mxu1 %v1189_v62  ;;  %v284_v33 = vpack.c.bf16 %v276_v29, %v268_v2  ;;  %v262_v34 = vmul.f32 0.2, %v246_v30  ;;  %v103_v52 = vmul.f32 %v70_v47, %v1385_v18  ;;  %v95_v48 = vmul.f32 %v70_v47, %v1361_v0 }
  0xaa   :  { %1123 = vmatprep.subr.bf16.mxu1 %v1191_v28  ;;  %v270_v22 = vmax.f32 %v238_v27, %v254_v21  ;;  %v105_v56 = vmul.f32 %v78_v53, %v1385_v18  ;;  %v97_v6 = vmul.f32 %v78_v53, %v1361_v0  ;;  %v202_v58 = vrot.slane %v1339_v44, %v77_v41  ;;  %v1217_v28 = vld [vmem:[#allocation2 + $0x1b8] sm:$0xff]  }
  0xab   :  { %920 = vmatprep.mubr.bf16.mxu0 %v284_v33  ;;  %v278_v36 = vmax.f32 %v246_v30, %v262_v34  ;;  %1102 = vmatpush3.bf16.msra.mxu0 %v1192_v31  ;;  %v160_v57 = vadd.f32 %v127_v49, %v103_v52  ;;  %v152_v9 = vadd.f32 %v127_v49, %v95_v48  ;;  %v990_v33 = vld [vmem:[%s1442_s4] ss:$0 sm:$0xff]  ;;  %s1271_s4 = smov [#allocation5]  }
  0xac   :  { %1103 = vmatprep.subr.bf16.mxu0 %v1194_v32  ;;  %v219_v10 = vmul.f32 %v194_v55, %v1359_v63  ;;  %v227_v18 = vmul.f32 %v194_v55, %v1383_v17  ;;  %v162_v11 = vadd.f32 %v135_v43, %v105_v56  ;;  %v154_v0 = vadd.f32 %v135_v43, %v97_v6  ;;  %s977_s15 = sshll.u32 %s1271_s4, 4  ;;  %s978_s15 = int_to_ptr.vmem [resolvable:$true] %s977_s15 }
  0xad   :  { %v286_v42 = vpack.c.bf16 %v278_v36, %v270_v22  ;;  %1124 = vmatpush3.bf16.msra.mxu1 %v1193_v3  ;;  %v221_v40 = vmul.f32 %v202_v58, %v1359_v63  ;;  %v229_v44 = vmul.f32 %v202_v58, %v1383_v17  ;;  %v1216_v17 = vld [vmem:[#allocation2 + $0x138] sm:$0xff]   ;;  %s1240_s16 = scalar_lea.vmem %s978_s15, 256  ;;  %p1245_p9 = scmp.lt.s32.totalorder %s978_s15, %s978_s15 }
  0xae   :  { %1125 = vmatprep.subr.bf16.mxu1 %v1195_v35  ;;  %v243_v13 = vadd.f32 %v227_v18, %v160_v57  ;;  %v235_v19 = vadd.f32 %v219_v10, %v152_v9  ;;  %p1241_p8 = scmp.ne.s32.totalorder %s978_s15, %s1240_s16  ;;  %p1246_p10 = scmp.lt.s32.totalorder %s1240_s16, %s1240_s16 }
  0xaf   :  { %961 = vmatprep.mubr.bf16.mxu1 %v286_v42  ;;  %1104 = vmatpush3.bf16.msra.mxu0 %v1196_v37  ;;  %v245_v20 = vadd.f32 %v229_v44, %v162_v11  ;;  %v237_v62 = vadd.f32 %v221_v40, %v154_v0 }
  0xb0   :  { %1105 = vmatprep.subr.bf16.mxu0 %v1198_v38  ;;  %v259_v24 = vmul.f32 0.2, %v243_v13  ;;  %v251_v16 = vmul.f32 0.2, %v235_v19  ;;  %p1247_p11 = por %p1246_p10, %p1245_p9 }
  0xb1   :  { %1126 = vmatpush3.bf16.msra.mxu1 %v1197_v45  ;;  %v261_v63 = vmul.f32 0.2, %v245_v20  ;;  %v253_v27 = vmul.f32 0.2, %v237_v62 }
  0xb2   :  { %1127 = vmatprep.subr.bf16.mxu1 %v1199_v46  ;;  %v275_v26 = vmax.f32 %v243_v13, %v259_v24  ;;  %v267_v2 = vmax.f32 %v235_v19, %v251_v16  ;;  %p1248_p12 = pnand %p1247_p11, %p1241_p8 }
  0xb3   :  { %1106 = vmatpush3.bf16.msra.mxu0 %v1200_v50  ;;  %v277_v29 = vmax.f32 %v245_v20, %v261_v63  ;;  %v269_v31 = vmax.f32 %v237_v62, %v253_v27 }
  0xb4   :  { %1107 = vmatprep.subr.bf16.mxu0 %v1202_v51  ;;  %v283_v30 = vpack.c.bf16 %v275_v26, %v267_v2 }
  0xb5   :  { %1128 = vmatpush3.bf16.msra.mxu1 %v1201_v54  ;;  %v285_v21 = vpack.c.bf16 %v277_v29, %v269_v31 }
  0xb6   :  { %1129 = vmatprep.subr.bf16.mxu1 %v1203_v39 }
  0xb7   :  { %1108 = vmatpush3.bf16.msra.mxu0 %v1204_v59 }
  0xb8   :  { %1109 = vmatprep.subr.bf16.mxu0 %v1206_v5 }
  0xb9   :  { %1130 = vmatpush3.bf16.msra.mxu1 %v1205_v7 }
  0xba   :  { %1131 = vmatprep.subr.bf16.mxu1 %v1207_v8 }
  0xbb   :  { %1110 = vmatpush3.bf16.msra.mxu0 %v1208_v60 }
  0xbc   :  { %1111 = vmatprep.subr.bf16.mxu0 %v1210_v12 }
  0xbd   :  { %1132 = vmatpush3.bf16.msra.mxu1 %v1209_v14 }
  0xbe   :  { %1133 = vmatprep.subr.bf16.mxu1 %v1211_v61 }
  0xbf   :  { %1112 = vmatpush3.bf16.msra.mxu0 %v1212_v23 }
  0xc0   :  { %1113 = vmatprep.subr.bf16.mxu0 %v1214_v15 }
  0xc1   :  { %1134 = vmatpush3.bf16.msra.mxu1 %v1213_v1 }
  0xc2   :  { %1135 = vmatprep.subr.bf16.mxu1 %v1215_v25 }
  0xc3   :  { %1114 = vmatpush3.bf16.msra.mxu0 %v1216_v17 }
  0xc5   :  { %1136 = vmatpush3.bf16.msra.mxu1 %v1217_v28 }
  0xc6   :  { %921 = vmatmul.mubr.bf16.vlgmr.msra.gmra.mrb[4].mxu0 %v283_v30 }
  0xc8   :  { %962 = vmatmul.mubr.bf16.vlgmr.msra.gmra.mrb[4].mxu1 %v285_v21 }
 0x179   :  { %v1071_v32 = vpop.f32.mrb[0].mxu0 }
 0x17a   :  { %v1072_v34 = vpop.f32.mrb[1].mxu0 }
 0x17b   :  { %v1093_v3 = vpop.f32.mrb[0].mxu1  ;;  %v1073_v35 = vadd.f32 %v1072_v34, %v1071_v32  ;;  %v1074_v4 = vpop.f32.mrb[2].mxu0 }
 0x17c   :  { %v1094_v22 = vpop.f32.mrb[1].mxu1  ;;  %v1075_v36 = vpop.f32.mrb[3].mxu0 }
 0x17d   :  { %v841_v37 = vadd.f32 %v1073_v35, %v990_v33  ;;  %v1095_v38 = vadd.f32 %v1094_v22, %v1093_v3  ;;  %v1096_v41 = vpop.f32.mrb[2].mxu1  ;;  %v1076_v42 = vadd.f32 %v1075_v36, %v1074_v4 }
 0x17e   :  { %v1097_v45 = vpop.f32.mrb[3].mxu1 }
 0x17f   :  { %v882_v46 = vadd.f32 %v1095_v38, %v841_v37  ;;  %v844_v47 = vadd.f32 %v1076_v42, %v990_v33  ;;  %v1098_v50 = vadd.f32 %v1097_v45, %v1096_v41 }
 0x181   :  { %v885_v51 = vadd.f32 %v1098_v50, %v844_v47 }
 0x199   :  { %v1115_v52 = vpop.f32.mrb[4].mxu0 }
 0x19a   :  { %v1116_v53 = vpop.f32.mrb[5].mxu0 }
 0x19b   :  { %v1137_v54 = vpop.f32.mrb[4].mxu1  ;;  %v1117_v39 = vadd.f32 %v1116_v53, %v1115_v52  ;;  %v1118_v48 = vpop.f32.mrb[6].mxu0 }
 0x19c   :  { %v1138_v49 = vpop.f32.mrb[5].mxu1  ;;  %v1119_v55 = vpop.f32.mrb[7].mxu0 }
 0x19d   :  { %v923_v56 = vadd.f32 %v1117_v39, %v882_v46  ;;  %v1139_v59 = vadd.f32 %v1138_v49, %v1137_v54  ;;  %v1140_v5 = vpop.f32.mrb[6].mxu1  ;;  %v1120_v57 = vadd.f32 %v1119_v55, %v1118_v48 }
 0x19e   :  { %v1141_v6 = vpop.f32.mrb[7].mxu1 }
 0x19f   :  { %v964_v43 = vadd.f32 %v1139_v59, %v923_v56  ;;  %v926_v58 = vadd.f32 %v1120_v57, %v885_v51  ;;  %v1142_v7 = vadd.f32 %v1141_v6, %v1140_v5 }
 0x1a1   :  { %970 = vst [vmem:[#allocation5] sm:$0xff] %v964_v43  ;;  %v967_v8 = vadd.f32 %v1142_v7, %v926_v58 }
 0x1a3   :  { %971 = vst [vmem:[#allocation5 + $0x8] sm:$0xff] %v967_v8 }
 0x1a4   :  { %1251 = shalt.err (!%p1248_p12)
}
 0x1a5   :  { %s1252_s19 = scalar_lea.hbm %s1443_s5, 256 }
 0x1a6   :  { %p1253_p13 = scmp.ne.s32.totalorder %s1443_s5, %s1252_s19  ;;  %p1256_p0 = scmp.lt.u32.totalorder %s1252_s19, %s1443_s5 }
 0x1a8   :  { %p1258_p1 = pnand %p1256_p0, %p1253_p13 }
 0x1aa   :  { %1261 = shalt.err (!%p1258_p1)
}
 0x1ab   :  { %s1272_s24 = smov 128   ;;  %s1273_s25 = smov 8  }
 0x1ac   :  { %983 = dma.vmem_to_hbm [thread:$0]  %s978_s15, 256, %s1443_s5, [#allocation4], %s1272_s24, %s1272_s24, %s1273_s25  }
 0x1ad   :  { %1264 = dma.done.wait [#allocation4], 256  }
 0x1ae   :  { %1265 = vsyncadd [#allocation4], 4294967040 }
 0x1af   :  { %987 = vsyncpa [#allocation3], 1 }
 0x1b0   :  { %988 = vsyncpa [#allocation4], 1 }

</bundles_post_ra>
